<compile_context>
chip_gen: v7x
topology: tpu7x:2x2x1
jax: 0.10.0
libtpu: 0.0.40
codegen_flags: <defaults>
</compile_context>

<pallas_src>
import jax
import jax.numpy as jnp
from jax.experimental import pallas as pl
from jax.experimental.pallas import tpu as pltpu

IN_FEATURES = 28 * 28          # 784  (multiple of 8 -> fine as sublane dim)
OUT_FEATURES = 10
OUT_PAD = 128                  # lane-dense output width (unmasked vst)
TB_MAX = 2048                  # batch tile (2 x-buffers f32 + out ~= 15 MiB)
VMEM_LIMIT = 32 * 1024 * 1024  # > v5e 16 MiB scoped default, < v7x 64 MiB phys
NEG_BIG = -1e30                # "minus infinity" for padded logit columns


def _round_up(x, m):
    return ((x + m - 1) // m) * m


def logreg_kernel(x_ref, w_ref, b_ref, o_ref):
    # x streamed as f32; cast to bf16 in-register (VPU, hidden under DMA) so
    # the MXU runs its fast bf16 path with f32 accumulation.
    x_bf16 = x_ref[...].astype(jnp.bfloat16)                     # (TB, 784)
    logits = jnp.dot(
        x_bf16, w_ref[...], preferred_element_type=jnp.float32
    ) + b_ref[...]                                               # (TB, 128) f32
    # Numerically-stable log_softmax.  Padded columns carry bias=NEG_BIG so
    # they never win the max and their exp underflows cleanly to 0 (f32).
    m = jnp.max(logits, axis=-1, keepdims=True)                  # (TB, 1)
    shifted = logits - m
    lse = jnp.log(jnp.sum(jnp.exp(shifted), axis=-1, keepdims=True))
    o_ref[...] = (shifted - lse).astype(o_ref.dtype)


def logreg_forward(x, w, b):
    """x: [B, 784] f32, w: [784, 10] f32, b: [10] or [1, 10] f32 -> [B, 10] f32."""
    B = x.shape[0]
    TB = min(TB_MAX, _round_up(B, 8))       # multiple of 8 (f32 sublane pack)
    grid = (pl.cdiv(B, TB),)                # partial edge block; no row padding

    # Tiny resident weight/bias prep (layout plumbing; x is fed untouched).
    w_p = jnp.zeros((IN_FEATURES, OUT_PAD), jnp.bfloat16)
    w_p = w_p.at[:, :OUT_FEATURES].set(w.astype(jnp.bfloat16))
    b_p = jnp.full((1, OUT_PAD), NEG_BIG, jnp.float32)
    b_p = b_p.at[0, :OUT_FEATURES].set(jnp.reshape(b, (-1,)).astype(jnp.float32))

    cost = pl.CostEstimate(
        flops=2 * B * IN_FEATURES * OUT_PAD,
        transcendentals=B * (OUT_PAD + 1),
        bytes_accessed=(B * IN_FEATURES * 4            # x (f32, streamed)
                        + IN_FEATURES * OUT_PAD * 2    # w (bf16, resident)
                        + OUT_PAD * 4                  # bias
                        + B * OUT_PAD * 4),            # out (f32)
    )

    out_p = pl.pallas_call(
        logreg_kernel,
        out_shape=jax.ShapeDtypeStruct((B, OUT_PAD), jnp.float32),
        grid_spec=pltpu.PrefetchScalarGridSpec(
            num_scalar_prefetch=0,
            grid=grid,
            in_specs=[
                # Streamed x: last block dim == full array dim (784), so the
                # (8,128) rule is satisfied without padding K.
                pl.BlockSpec((TB, IN_FEATURES), lambda i: (i, 0)),
                # Resident weights / bias (same block every step).
                pl.BlockSpec((IN_FEATURES, OUT_PAD), lambda i: (0, 0)),
                pl.BlockSpec((1, OUT_PAD), lambda i: (0, 0)),
            ],
            out_specs=pl.BlockSpec((TB, OUT_PAD), lambda i: (i, 0)),
        ),
        compiler_params=pltpu.CompilerParams(
            dimension_semantics=("parallel",),
            vmem_limit_bytes=VMEM_LIMIT,
        ),
        cost_estimate=cost,
    )(x, w_p, b_p)

    # TODO(synk): downstream consumers that accept the (B, 128) padded layout
    # (e.g. fused NLL / argmax) should take out_p directly to avoid this pass.
    return out_p[:, :OUT_FEATURES]


def reference_forward(x, w, b):
    logits = x @ w + jnp.reshape(b, (1, -1))
    return jax.nn.log_softmax(logits, axis=-1)


if __name__ == "__main__":
    key = jax.random.PRNGKey(0)
    kx, kw, kb = jax.random.split(key, 3)

    B = 8
    # Deterministic synthetic parameters (PyTorch Linear-style uniform init).
    bound = 1.0 / (IN_FEATURES ** 0.5)
    w = jax.random.uniform(kw, (IN_FEATURES, OUT_FEATURES),
                           minval=-bound, maxval=bound, dtype=jnp.float32)
    b = jax.random.uniform(kb, (OUT_FEATURES,),
                           minval=-bound, maxval=bound, dtype=jnp.float32)
    x = jax.random.normal(kx, (B, IN_FEATURES), dtype=jnp.float32)

    out = logreg_forward(x, w, b)
    out = jax.block_until_ready(out)

    ref = reference_forward(x, w, b)
    assert out.shape == (B, OUT_FEATURES)
    # bf16 matmul inputs (f32 accumulation) -> loosened tolerance vs f32 ref.
    assert jnp.allclose(out, ref, atol=3e-2, rtol=0.0), "mismatch vs reference"
    # log_softmax rows should exp-sum to 1 (internal consistency, f32 math).
    assert jnp.allclose(jnp.sum(jnp.exp(out), axis=-1), 1.0, atol=1e-5)

    print("KERNEL_OK")
</pallas_src>

<mosaic_0001>
module attributes {stable_mosaic.version = 11 : i64} {
  func.func @logreg_kernel(%arg0: i32, %arg1: memref<8x784xf32, #tpu.memory_space<vmem>>, %arg2: memref<784x128xbf16, #tpu.memory_space<vmem>>, %arg3: memref<1x128xf32, #tpu.memory_space<vmem>>, %arg4: memref<8x128xf32, #tpu.memory_space<vmem>>) attributes {dimension_semantics = [#tpu.dimension_semantics<parallel>], iteration_bounds = array<i64: 1>, scalar_prefetch = 0 : i64, scratch_operands = 0 : i64, tpu.core_type = #tpu.core_type<tc>, window_params = [{transform_indices = @transform_0, window_bounds = array<i64: 8, 784>}, {pipeline_mode = #tpu.pipeline_mode<synchronous>, transform_indices = @transform_1, window_bounds = array<i64: 784, 128>}, {pipeline_mode = #tpu.pipeline_mode<synchronous>, transform_indices = @transform_2, window_bounds = array<i64: 1, 128>}, {transform_indices = @transform_3, window_bounds = array<i64: 8, 128>}]} {
    %c0 = arith.constant 0 : index
    %c0_0 = arith.constant 0 : index
    %0 = vector.load %arg1[%c0, %c0_0] : memref<8x784xf32, #tpu.memory_space<vmem>>, vector<8x784xf32>
    %1 = arith.truncf %0 : vector<8x784xf32> to vector<8x784xbf16>
    %c0_1 = arith.constant 0 : index
    %c0_2 = arith.constant 0 : index
    %2 = vector.load %arg2[%c0_1, %c0_2] : memref<784x128xbf16, #tpu.memory_space<vmem>>, vector<784x128xbf16>
    %cst = arith.constant dense<0.000000e+00> : vector<8x128xf32>
    %3 = tpu.matmul %1, %2, %cst {dimension_numbers = #tpu.dot_dimension_numbers<[1], [0], [0], [1], [0, 0, 1, 1], [], []>} : vector<8x784xbf16>, vector<784x128xbf16>, vector<8x128xf32> -> vector<8x128xf32>
    %c0_3 = arith.constant 0 : index
    %c0_4 = arith.constant 0 : index
    %4 = vector.load %arg3[%c0_3, %c0_4] : memref<1x128xf32, #tpu.memory_space<vmem>>, vector<1x128xf32>
    %5 = vector.broadcast %4 : vector<1x128xf32> to vector<8x128xf32>
    %6 = arith.addf %3, %5 : vector<8x128xf32>
    %cst_5 = arith.constant dense<0xFF800000> : vector<8xf32>
    %7 = vector.multi_reduction <maximumf>, %6, %cst_5 [1] : vector<8x128xf32> to vector<8xf32>
    %8 = vector.shape_cast %7 : vector<8xf32> to vector<8x1xf32>
    %9 = vector.broadcast %8 : vector<8x1xf32> to vector<8x128xf32>
    %10 = arith.subf %6, %9 : vector<8x128xf32>
    %11 = math.exp %10 : vector<8x128xf32>
    %cst_6 = arith.constant dense<0.000000e+00> : vector<8xf32>
    %12 = vector.multi_reduction <add>, %11, %cst_6 [1] : vector<8x128xf32> to vector<8xf32>
    %13 = vector.shape_cast %12 : vector<8xf32> to vector<8x1xf32>
    %14 = math.log %13 : vector<8x1xf32>
    %15 = vector.broadcast %14 : vector<8x1xf32> to vector<8x128xf32>
    %16 = arith.subf %10, %15 : vector<8x128xf32>
    %c0_7 = arith.constant 0 : index
    %c0_8 = arith.constant 0 : index
    %17 = vector.load %arg4[%c0_7, %c0_8] : memref<8x128xf32, #tpu.memory_space<vmem>>, vector<8x128xf32>
    tpu.vector_store %arg4[%c0_7, %c0_8], %16 {strides = array<i32>} : memref<8x128xf32, #tpu.memory_space<vmem>>, vector<8x128xf32>,
    return
  }
  func.func @transform_0(%arg0: i32) -> (i32, i32) {
    %c0_i32 = arith.constant 0 : i32
    %c0_i32_0 = arith.constant 0 : i32
    return %arg0, %c0_i32 : i32, i32
  }
  func.func @transform_1(%arg0: i32) -> (i32, i32) {
    %c0_i32 = arith.constant 0 : i32
    %c0_i32_0 = arith.constant 0 : i32
    %c0_i32_1 = arith.constant 0 : i32
    return %c0_i32, %c0_i32_0 : i32, i32
  }
  func.func @transform_2(%arg0: i32) -> (i32, i32) {
    %c0_i32 = arith.constant 0 : i32
    %c0_i32_0 = arith.constant 0 : i32
    %c0_i32_1 = arith.constant 0 : i32
    return %c0_i32, %c0_i32_0 : i32, i32
  }
  func.func @transform_3(%arg0: i32) -> (i32, i32) {
    %c0_i32 = arith.constant 0 : i32
    %c0_i32_0 = arith.constant 0 : i32
    return %arg0, %c0_i32 : i32, i32
  }
}

</mosaic_0001>

<bundles_post_ra>
// kernel: tpu_custom_call.1
= control target key start
LH: loop header
LB: loop body
LE: loop exit
PB: predicated region body
PF: predicated region fallthrough
CT: control target
= control target key end

     0   :  { %8 = vsyncpa [#allocation3], 0  ;;  %s976_s0 = inlined_call_operand.hbm [shape: f32[8,784], index: 0, kind: input, shape index: {}]   ;;  %s977_s1 = inlined_call_operand.hbm [shape: bf16[784,128], index: 1, kind: input, shape index: {}]   ;;  %s978_s2 = inlined_call_operand.vmem [shape: f32[1,128], index: 2, kind: input, shape index: {}]   ;;  %s979_s3 = inlined_call_operand.hbm [shape: f32[8,128], index: 3, kind: output, shape index: {}]  }
   0x1   :  { %9 = vsyncpa [#allocation6], 0 }
   0x2   :  { %10 = vsyncpa [#allocation4], 0  ;;  %s903_s12 = smov [#allocation2]   ;;  %s904_s14 = smov [#allocation5]  }
   0x3   :  { %s17_s13 = sshll.u32 %s903_s12, 4  ;;  %s26_s15 = sshll.u32 %s904_s14, 4  ;;  %s18_s13 = int_to_ptr.vmem [resolvable:$true] %s17_s13  ;;  %s930_s15 = int_to_ptr.vmem [resolvable:$true] %s26_s15 }
   0x4   :  { %s831_s18 = scalar_lea.hbm %s976_s0, 896 }
   0x5   :  { %p832_p0 = scmp.ne.s32.totalorder %s976_s0, %s831_s18  ;;  %p835_p1 = scmp.lt.u32.totalorder %s831_s18, %s976_s0 }
   0x7   :  { %p837_p2 = pnand %p835_p1, %p832_p0 }
   0x9   :  { %840 = shalt.err (!%p837_p2)
}
   0xa   :  { %s841_s23 = scalar_lea.vmem %s18_s13, 896  ;;  %p846_p4 = scmp.lt.s32.totalorder %s18_s13, %s18_s13 }
   0xb   :  { %p842_p3 = scmp.ne.s32.totalorder %s18_s13, %s841_s23  ;;  %p847_p5 = scmp.lt.s32.totalorder %s841_s23, %s841_s23 }
   0xd   :  { %p848_p6 = por %p847_p5, %p846_p4 }
   0xf   :  { %p849_p7 = pnand %p848_p6, %p842_p3 }
  0x11   :  { %852 = shalt.err (!%p849_p7)
}
  0x12   :  { %20 = dma.hbm_to_vmem [thread:$0]  %s976_s0, 896, %s18_s13, [#allocation3]  }
  0x13   :  { %s853_s28 = scalar_lea.hbm %s977_s1, 6272 }
  0x14   :  { %p854_p8 = scmp.ne.s32.totalorder %s977_s1, %s853_s28  ;;  %p857_p9 = scmp.lt.u32.totalorder %s853_s28, %s977_s1 }
  0x16   :  { %p859_p10 = pnand %p857_p9, %p854_p8 }
  0x18   :  { %862 = shalt.err (!%p859_p10)
}
  0x19   :  { %s863_s6 = scalar_lea.vmem %s930_s15, 6272  ;;  %p868_p12 = scmp.lt.s32.totalorder %s930_s15, %s930_s15 }
  0x1a   :  { %p864_p11 = scmp.ne.s32.totalorder %s930_s15, %s863_s6  ;;  %p869_p13 = scmp.lt.s32.totalorder %s863_s6, %s863_s6 }
  0x1c   :  { %p870_p0 = por %p869_p13, %p868_p12 }
  0x1e   :  { %p871_p1 = pnand %p870_p0, %p864_p11 }
  0x20   :  { %874 = shalt.err (!%p871_p1)
}
  0x21   :  { %s905_s0 = smov 64   ;;  %s906_s7 = smov 4  }
  0x22   :  { %32 = dma.hbm_to_vmem [thread:$0]  %s977_s1, 6272, %s930_s15, [#allocation6], %s905_s0, %s905_s0, %s906_s7  }
  0x23   :  { %897 = dma.done.wait [#allocation3], 896  }
  0x24   :  { %898 = vsyncadd [#allocation3], 4294966400 }
  0x25   :  { %899 = dma.done.wait [#allocation6], 6272  }
  0x26   :  { %900 = vsyncadd [#allocation6], 4294961024  ;;  %v778_v0 = vld [vmem:[#allocation5 + $0x40] sm:$0xff]   ;;  %v782_v4 = vld [vmem:[#allocation5 + $0x48] sm:$0xff]   ;;  %v907_v44 = vmov 0.0   ;;  %vm908_vm0 = vmmov 0  }
  0x27   :  { %v779_v1 = vld [vmem:[#allocation5] sm:$0xff]   ;;  %697 = vmatprep.subr.bf16.mxu0 %v778_v0  ;;  %v783_v5 = vld [vmem:[#allocation5 + $0x8] sm:$0xff]   ;;  %v786_v8 = vld [vmem:[#allocation5 + $0x50] sm:$0xff]   ;;  %vm455_vm1 = vcmask 130048  }
  0x28   :  { %v780_v2 = vld [vmem:[#allocation5 + $0xc0] sm:$0xff]   ;;  %698 = vmatpush3.bf16.msra.mxu0 %v779_v1  ;;  %v784_v6 = vld [vmem:[#allocation5 + $0xc8] sm:$0xff]   ;;  %v787_v9 = vld [vmem:[#allocation5 + $0x10] sm:$0xff]  }
  0x29   :  { %v781_v3 = vld [vmem:[#allocation5 + $0x80] sm:$0xff]   ;;  %719 = vmatprep.subr.bf16.mxu1 %v780_v2  ;;  %699 = vmatprep.subr.bf16.mxu0 %v782_v4  ;;  %v785_v7 = vld [vmem:[#allocation5 + $0x88] sm:$0xff]   ;;  %v788_v10 = vld [vmem:[#allocation5 + $0xd0] sm:$0xff]  }
  0x2a   :  { %720 = vmatpush3.bf16.msra.mxu1 %v781_v3  ;;  %v789_v11 = vld [vmem:[#allocation5 + $0x90] sm:$0xff]   ;;  %v790_v12 = vld [vmem:[#allocation5 + $0x58] sm:$0xff]   ;;  %v794_v16 = vld [vmem:[#allocation5 + $0x60] sm:$0xff]  }
  0x2b   :  { %721 = vmatprep.subr.bf16.mxu1 %v784_v6  ;;  %v791_v13 = vld [vmem:[#allocation5 + $0x18] sm:$0xff]   ;;  %v795_v17 = vld [vmem:[#allocation5 + $0x20] sm:$0xff]   ;;  %v798_v20 = vld [vmem:[#allocation5 + $0x68] sm:$0xff]  }
  0x2c   :  { %700 = vmatpush3.bf16.msra.mxu0 %v783_v5  ;;  %v792_v14 = vld [vmem:[#allocation5 + $0xd8] sm:$0xff]   ;;  %v796_v18 = vld [vmem:[#allocation5 + $0xe0] sm:$0xff]   ;;  %v799_v21 = vld [vmem:[#allocation5 + $0x28] sm:$0xff]  }
  0x2d   :  { %701 = vmatprep.subr.bf16.mxu0 %v786_v8  ;;  %v793_v15 = vld [vmem:[#allocation5 + $0x98] sm:$0xff]   ;;  %v797_v19 = vld [vmem:[#allocation5 + $0xa0] sm:$0xff]   ;;  %v800_v22 = vld [vmem:[#allocation5 + $0xe8] sm:$0xff]  }
  0x2e   :  { %722 = vmatpush3.bf16.msra.mxu1 %v785_v7  ;;  %v801_v23 = vld [vmem:[#allocation5 + $0xa8] sm:$0xff]   ;;  %v802_v24 = vld [vmem:[#allocation5 + $0x70] sm:$0xff]   ;;  %v806_v28 = vld [vmem:[#allocation5 + $0x78] sm:$0xff]  }
  0x2f   :  { %723 = vmatprep.subr.bf16.mxu1 %v788_v10  ;;  %v803_v25 = vld [vmem:[#allocation5 + $0x30] sm:$0xff]   ;;  %v807_v29 = vld [vmem:[#allocation5 + $0x38] sm:$0xff]   ;;  %v42_v34 = vld [vmem:[#allocation2] sm:$0xff] }
  0x30   :  { %702 = vmatpush3.bf16.msra.mxu0 %v787_v9  ;;  %v804_v26 = vld [vmem:[#allocation5 + $0xf0] sm:$0xff]   ;;  %v808_v30 = vld [vmem:[#allocation5 + $0xf8] sm:$0xff]   ;;  %v49_v35 = vpack.c.bf16 %v42_v34, %v42_v34  ;;  %v810_v36 = vld [vmem:[#allocation5 + $0x140] sm:$0xff]  }
  0x31   :  { %703 = vmatprep.subr.bf16.mxu0 %v790_v12  ;;  %v805_v27 = vld [vmem:[#allocation5 + $0xb0] sm:$0xff]   ;;  %v809_v33 = vld [vmem:[#allocation5 + $0xb8] sm:$0xff]   ;;  %v45_v37 = vld [vmem:[#allocation2 + $0x18] sm:$0xff] }
  0x32   :  { %724 = vmatpush3.bf16.msra.mxu1 %v789_v11  ;;  %v43_v31 = vld [vmem:[#allocation2 + $0x8] sm:$0xff]  ;;  %v52_v38 = vpack.c.bf16 %v45_v37, %v45_v37  ;;  %v811_v39 = vld [vmem:[#allocation5 + $0x100] sm:$0xff]   ;;  %v44_v40 = vld [vmem:[#allocation2 + $0x10] sm:$0xff] }
  0x33   :  { %725 = vmatprep.subr.bf16.mxu1 %v792_v14  ;;  %v50_v32 = vpack.c.bf16 %v43_v31, %v43_v31  ;;  %v51_v41 = vpack.c.bf16 %v44_v40, %v44_v40  ;;  %v812_v42 = vld [vmem:[#allocation5 + $0x148] sm:$0xff]   ;;  %v814_v45 = vld [vmem:[#allocation5 + $0x150] sm:$0xff]   ;;  %v816_v47 = vld [vmem:[#allocation5 + $0x158] sm:$0xff]  }
  0x34   :  { %704 = vmatpush3.bf16.msra.mxu0 %v791_v13  ;;  %531 = vmatprep.mubr.bf16.mxu1 %v52_v38  ;;  %v813_v43 = vld [vmem:[#allocation5 + $0x108] sm:$0xff]   ;;  %v815_v46 = vld [vmem:[#allocation5 + $0x110] sm:$0xff]   ;;  %v817_v48 = vld [vmem:[#allocation5 + $0x118] sm:$0xff]  }
  0x35   :  { %705 = vmatprep.subr.bf16.mxu0 %v794_v16  ;;  %491 = vmatprep.mubr.bf16.mxu0 %v50_v32  ;;  %v818_v49 = vld [vmem:[#allocation5 + $0x160] sm:$0xff]   ;;  %v820_v51 = vld [vmem:[#allocation5 + $0x168] sm:$0xff]   ;;  %v47_v53 = vld [vmem:[#allocation2 + $0x28] sm:$0xff] }
  0x36   :  { %726 = vmatpush3.bf16.msra.mxu1 %v793_v15  ;;  %v819_v50 = vld [vmem:[#allocation5 + $0x120] sm:$0xff]   ;;  %v54_v54 = vpack.c.bf16 %v47_v53, %v47_v53  ;;  %v48_v55 = vld [vmem:[#allocation2 + $0x30] sm:$0xff]  ;;  %v821_v56 = vld [vmem:[#allocation5 + $0x128] sm:$0xff]  }
  0x37   :  { %727 = vmatprep.subr.bf16.mxu1 %v796_v18  ;;  %v826_v52 = vld [vmem:[#allocation5 + $0x180] sm:$0xff]   ;;  %v55_v57 = vpack.c.bf16 %v48_v55, %v48_v55  ;;  %v822_v58 = vld [vmem:[#allocation5 + $0x170] sm:$0xff]   ;;  %v824_v60 = vld [vmem:[#allocation5 + $0x178] sm:$0xff]  }
  0x38   :  { %706 = vmatpush3.bf16.msra.mxu0 %v795_v17  ;;  %v823_v59 = vld [vmem:[#allocation5 + $0x130] sm:$0xff]   ;;  %v825_v61 = vld [vmem:[#allocation5 + $0x138] sm:$0xff]   ;;  %v46_v62 = vld [vmem:[#allocation2 + $0x20] sm:$0xff] }
  0x39   :  { %707 = vmatprep.subr.bf16.mxu0 %v798_v20  ;;  %v53_v63 = vpack.c.bf16 %v46_v62, %v46_v62  ;;  %v646_v1 = vld [vmem:[%s978_s2] ss:$0 sm:$0xff]  ;;  %s909_s2 = smov [#allocation7]  }
  0x3a   :  { %728 = vmatpush3.bf16.msra.mxu1 %v797_v19  ;;  %s636_s11 = sshll.u32 %s909_s2, 4  ;;  %s637_s11 = int_to_ptr.vmem [resolvable:$true] %s636_s11 }
  0x3b   :  { %729 = vmatprep.subr.bf16.mxu1 %v800_v22  ;;  %s875_s12 = scalar_lea.vmem %s637_s11, 128  ;;  %p880_p3 = scmp.lt.s32.totalorder %s637_s11, %s637_s11 }
  0x3c   :  { %708 = vmatpush3.bf16.msra.mxu0 %v799_v21  ;;  %p876_p2 = scmp.ne.s32.totalorder %s637_s11, %s875_s12  ;;  %p881_p4 = scmp.lt.s32.totalorder %s875_s12, %s875_s12 }
  0x3d   :  { %709 = vmatprep.subr.bf16.mxu0 %v802_v24 }
  0x3e   :  { %730 = vmatpush3.bf16.msra.mxu1 %v801_v23  ;;  %p882_p5 = por %p881_p4, %p880_p3 }
  0x3f   :  { %731 = vmatprep.subr.bf16.mxu1 %v804_v26 }
  0x40   :  { %710 = vmatpush3.bf16.msra.mxu0 %v803_v25  ;;  %p883_p6 = pnand %p882_p5, %p876_p2 }
  0x41   :  { %711 = vmatprep.subr.bf16.mxu0 %v806_v28 }
  0x42   :  { %732 = vmatpush3.bf16.msra.mxu1 %v805_v27 }
  0x43   :  { %733 = vmatprep.subr.bf16.mxu1 %v808_v30 }
  0x44   :  { %712 = vmatpush3.bf16.msra.mxu0 %v807_v29 }
  0x45   :  { %741 = vmatprep.subr.bf16.mxu0 %v810_v36 }
  0x46   :  { %734 = vmatpush3.bf16.msra.mxu1 %v809_v33 }
  0x47   :  { %492 = vmatmul.mubr.bf16.vlgmr.msra.gmra.mrb[0].mxu0 %v49_v35  ;;  %765 = vmatprep.subr.bf16.mxu1 %v907_v44 }
  0x48   :  { %742 = vmatpush3.bf16.msra.mxu0 %v811_v39  ;;  %571 = vmatprep.mubr.bf16.mxu0 %v54_v54 }
  0x49   :  { %532 = vmatmul.mubr.bf16.vlgmr.msra.gmra.mrb[0].mxu1 %v51_v41  ;;  %743 = vmatprep.subr.bf16.mxu0 %v812_v42 }
  0x4a   :  { %767 = vmatprep.mubr.msk.bf16.mxu1 %vm908_vm0, %v907_v44  ;;  %766 = vmatpush3.bf16.msra.mxu1 %v826_v52 }
  0x4c   :  { %744 = vmatpush3.bf16.msra.mxu0 %v813_v43 }
  0x4d   :  { %745 = vmatprep.subr.bf16.mxu0 %v814_v45 }
  0x50   :  { %746 = vmatpush3.bf16.msra.mxu0 %v815_v46 }
  0x51   :  { %747 = vmatprep.subr.bf16.mxu0 %v816_v47  ;;  %768 = vmatmul.mubr.msk.bf16.vlgmr.msra.gmra.mrb[4].mxu1 %vm455_vm1, %v55_v57 }
  0x54   :  { %748 = vmatpush3.bf16.msra.mxu0 %v817_v48 }
  0x55   :  { %749 = vmatprep.subr.bf16.mxu0 %v818_v49 }
  0x58   :  { %750 = vmatpush3.bf16.msra.mxu0 %v819_v50 }
  0x59   :  { %751 = vmatprep.subr.bf16.mxu0 %v820_v51 }
  0x5c   :  { %752 = vmatpush3.bf16.msra.mxu0 %v821_v56 }
  0x5d   :  { %753 = vmatprep.subr.bf16.mxu0 %v822_v58 }
  0x60   :  { %754 = vmatpush3.bf16.msra.mxu0 %v823_v59 }
  0x61   :  { %755 = vmatprep.subr.bf16.mxu0 %v824_v60 }
  0x64   :  { %756 = vmatpush3.bf16.msra.mxu0 %v825_v61 }
  0x67   :  { %572 = vmatmul.mubr.bf16.vlgmr.msra.gmra.mrb[4].mxu0 %v53_v63 }
 0x11a   :  { %v713_v0 = vpop.f32.mrb[0].mxu0 }
 0x11b   :  { %v714_v2 = vpop.f32.mrb[1].mxu0 }
 0x11c   :  { %v715_v3 = vadd.f32 %v714_v2, %v713_v0  ;;  %v716_v4 = vpop.f32.mrb[2].mxu0  ;;  %v735_v5 = vpop.f32.mrb[0].mxu1 }
 0x11d   :  { %v717_v6 = vpop.f32.mrb[3].mxu0  ;;  %v736_v8 = vpop.f32.mrb[1].mxu1 }
 0x11e   :  { %v494_v7 = vadd.f32 %v715_v3, %v646_v1  ;;  %v737_v9 = vadd.f32 %v736_v8, %v735_v5  ;;  %v738_v10 = vpop.f32.mrb[2].mxu1 }
 0x11f   :  { %v739_v11 = vpop.f32.mrb[3].mxu1 }
 0x120   :  { %v534_v12 = vadd.f32 %v737_v9, %v494_v7 }
 0x124   :  { %v613_v13 = vpop.f32.mrb[4].mxu1 }
 0x125   :  { %v769_v14 = vpop.f32.mrb[5].mxu1 }
 0x126   :  { %v616_v15 = vpop.f32.mrb[6].mxu1 }
 0x127   :  { %v770_v16 = vpop.f32.mrb[7].mxu1 }
 0x13a   :  { %v757_v17 = vpop.f32.mrb[4].mxu0 }
 0x13b   :  { %v758_v18 = vpop.f32.mrb[5].mxu0 }
 0x13c   :  { %v759_v19 = vadd.f32 %v758_v18, %v757_v17  ;;  %v760_v20 = vpop.f32.mrb[6].mxu0 }
 0x13d   :  { %v761_v21 = vpop.f32.mrb[7].mxu0 }
 0x13e   :  { %v574_v22 = vadd.f32 %v759_v19, %v534_v12 }
 0x140   :  { %v614_v23 = vadd.f32 %v613_v13, %v574_v22 }
 0x142   :  { %619 = vmax.xlane.f32.xlu0 %v614_v23 }
 0x1cf   :  { %v620_v24 = vpop.xlane.xlu0 %619 }
 0x1d0   :  { %v621_v25 = vsub.f32 %v614_v23, %v620_v24 }
 0x1d2   :  { %v622_v26 = vmul.f32 1.442695, %v621_v25 }
 0x1d4   :  { %827 = vpow2.f32 %v622_v26 }
 0x1de   :  { %v828_v27 = vpop.eup %827 }
 0x1df   :  { %624 = vadd.xlane.f32.xlu0 %v828_v27 }
 0x26c   :  { %v625_v28 = vpop.xlane.xlu0 %624 }
 0x26d   :  { %829 = vlog2.f32 %v625_v28 }
 0x277   :  { %v830_v29 = vpop.eup %829 }
 0x278   :  { %v627_v30 = vmul.f32 0.6931472, %v830_v29 }
 0x27a   :  { %v628_v31 = vsub.f32 %v621_v25, %v627_v30 }
 0x27c   :  { %629 = vst [vmem:[#allocation7] sm:$0xff] %v628_v31 }
 0x27d   :  { %886 = shalt.err (!%p883_p6)
}
 0x27e   :  { %s887_s15 = scalar_lea.hbm %s979_s3, 128 }
 0x27f   :  { %p888_p7 = scmp.ne.s32.totalorder %s979_s3, %s887_s15  ;;  %p891_p8 = scmp.lt.u32.totalorder %s887_s15, %s979_s3 }
 0x281   :  { %p893_p9 = pnand %p891_p8, %p888_p7 }
 0x283   :  { %896 = shalt.err (!%p893_p9)
}
 0x284   :  { %639 = dma.vmem_to_hbm [thread:$0]  %s637_s11, 128, %s979_s3, [#allocation4]  }
 0x285   :  { %901 = dma.done.wait [#allocation4], 128  }
 0x286   :  { %902 = vsyncadd [#allocation4], 4294967168 }
 0x287   :  { %643 = vsyncpa [#allocation3], 1 }
 0x288   :  { %644 = vsyncpa [#allocation6], 1 }
 0x289   :  { %645 = vsyncpa [#allocation4], 1 }

</bundles_post_ra>
